<compile_context>
chip_gen: v7x
topology: tpu7x:2x2x1
jax: 0.10.0
libtpu: 0.0.40
codegen_flags: <defaults>
</compile_context>

<pallas_src>
import jax
import jax.numpy as jnp
from jax.experimental import pallas as pl
from jax.experimental.pallas import tpu as pltpu

# ---- model sizes -----------------------------------------------------------
BOARD = 8
F_IN = BOARD * BOARD        # 64
H1 = 32                     # LSTM hidden (hidden_dim_1)
H2 = 32                     # hidden_dim_2
OUT = BOARD * BOARD         # 64
B = 2                       # batch
T = 8                       # sequence length
B_PAD = 8                   # batch padded to one full f32 sublane tile


def lstm_head_kernel(x_ref, wih_ref, whh_ref, b_ref,
                     w2_ref, b2_ref, w3_ref, b3_ref, out_ref):
    """Full forward: LSTM recurrence + ReLU/Linear head + softmax.

    x_ref   : (T, B_PAD, F_IN)  time-major, batch-padded input sequence
    wih_ref : (F_IN, 4*H1)      input->gates   (gate order i, f, g, o)
    whh_ref : (H1, 4*H1)        hidden->gates
    b_ref   : (1, 4*H1)         b_ih + b_hh combined
    w2_ref  : (H1, H2), b2_ref : (1, H2)
    w3_ref  : (H2, OUT), b3_ref: (1, OUT)
    out_ref : (B_PAD, OUT)      softmax probabilities (first B rows valid)
    """
    t_steps, bsz, f_in = x_ref.shape          # static: (8, 8, 64)
    h_dim = whh_ref.shape[0]                  # 32

    # ---- hoisted input projection: one batched MXU matmul, bias folded ----
    x2d = x_ref[...].reshape(t_steps * bsz, f_in)                  # (T*Bp, F_IN)
    ih = jnp.dot(x2d, wih_ref[...],
                 preferred_element_type=jnp.float32) + b_ref[...]  # (T*Bp, 4H)

    whh = whh_ref[...]
    h = jnp.zeros((bsz, h_dim), jnp.float32)
    c = jnp.zeros((bsz, h_dim), jnp.float32)

    # ---- statically unrolled recurrence; only h @ W_hh is serial ----------
    for t in range(t_steps):
        ih_t = ih[t * bsz:(t + 1) * bsz, :]                        # contiguous slab
        gates = ih_t + jnp.dot(h, whh, preferred_element_type=jnp.float32)
        sig = jax.nn.sigmoid(gates)          # full-width: 1 EUP push
        th = jnp.tanh(gates)                 # full-width: 1 EUP push
        i_g = sig[:, 0:h_dim]
        f_g = sig[:, h_dim:2 * h_dim]
        g_g = th[:, 2 * h_dim:3 * h_dim]
        o_g = sig[:, 3 * h_dim:4 * h_dim]
        c = f_g * c + i_g * g_g
        h = o_g * jnp.tanh(c)

    # ---- head: ReLU -> lin2 -> ReLU -> lin3 --------------------------------
    y = jnp.maximum(h, 0.0)
    y = jnp.dot(y, w2_ref[...], preferred_element_type=jnp.float32) + b2_ref[...]
    y = jnp.maximum(y, 0.0)
    logits = jnp.dot(y, w3_ref[...], preferred_element_type=jnp.float32) + b3_ref[...]

    # ---- softmax over dim=1 (class axis), EUP reciprocal -------------------
    m = jnp.max(logits, axis=1, keepdims=True)
    e = jnp.exp(logits - m)
    denom = jnp.sum(e, axis=1, keepdims=True)
    out_ref[...] = e * pl.reciprocal(denom, approx=True)


def lstms_forward(seq, params):
    """seq: (B, T, BOARD, BOARD) float32 -> (B, OUT) softmax probabilities."""
    b, t = seq.shape[0], seq.shape[1]
    x = seq.reshape(b, t, F_IN)                         # flatten(start_dim=2), free
    x = jnp.transpose(x, (1, 0, 2))                     # time-major (T, B, F)
    x = jnp.pad(x, ((0, 0), (0, B_PAD - b), (0, 0)))    # pad batch -> 8 sublanes
    # (transpose + pad fuse into one tiny XLA copy; the pad is required anyway)

    wih, whh, bias, w2, b2, w3, b3 = params
    vmem = pl.BlockSpec(memory_space=pltpu.MemorySpace.VMEM)

    out = pl.pallas_call(
        lstm_head_kernel,
        out_shape=jax.ShapeDtypeStruct((B_PAD, OUT), jnp.float32),
        in_specs=[vmem] * 8,
        out_specs=vmem,
    )(x, wih, whh, bias, w2, b2, w3, b3)
    return out[:b]


lstms_forward = jax.jit(lstms_forward)


def init_params(key):
    """Deterministic init mirroring PyTorch default uniform ranges/shapes."""
    ks = jax.random.split(key, 8)
    s_lstm = 1.0 / jnp.sqrt(H1)
    # PyTorch LSTM stores (4H, in); we keep the transposed (in, 4H) layout.
    wih = jax.random.uniform(ks[0], (F_IN, 4 * H1), jnp.float32, -s_lstm, s_lstm)
    whh = jax.random.uniform(ks[1], (H1, 4 * H1), jnp.float32, -s_lstm, s_lstm)
    b_ih = jax.random.uniform(ks[2], (1, 4 * H1), jnp.float32, -s_lstm, s_lstm)
    b_hh = jax.random.uniform(ks[3], (1, 4 * H1), jnp.float32, -s_lstm, s_lstm)
    bias = b_ih + b_hh

    s2 = 1.0 / jnp.sqrt(H1)
    w2 = jax.random.uniform(ks[4], (H1, H2), jnp.float32, -s2, s2)
    b2 = jax.random.uniform(ks[5], (1, H2), jnp.float32, -s2, s2)
    s3 = 1.0 / jnp.sqrt(H2)
    w3 = jax.random.uniform(ks[6], (H2, OUT), jnp.float32, -s3, s3)
    b3 = jax.random.uniform(ks[7], (1, OUT), jnp.float32, -s3, s3)
    return (wih, whh, bias, w2, b2, w3, b3)


def reference_forward(seq, params):
    """Pure-JAX reference for correctness checking."""
    wih, whh, bias, w2, b2, w3, b3 = params
    b, t = seq.shape[0], seq.shape[1]
    x = seq.reshape(b, t, F_IN)
    h = jnp.zeros((b, H1), jnp.float32)
    c = jnp.zeros((b, H1), jnp.float32)
    for ti in range(t):
        gates = x[:, ti, :] @ wih + h @ whh + bias
        i_g = jax.nn.sigmoid(gates[:, 0:H1])
        f_g = jax.nn.sigmoid(gates[:, H1:2 * H1])
        g_g = jnp.tanh(gates[:, 2 * H1:3 * H1])
        o_g = jax.nn.sigmoid(gates[:, 3 * H1:4 * H1])
        c = f_g * c + i_g * g_g
        h = o_g * jnp.tanh(c)
    y = jnp.maximum(h, 0.0) @ w2 + b2
    logits = jnp.maximum(y, 0.0) @ w3 + b3
    return jax.nn.softmax(logits, axis=1)


if __name__ == "__main__":
    key = jax.random.PRNGKey(0)
    k_in, k_par = jax.random.split(key)
    seq = jax.random.normal(k_in, (B, T, BOARD, BOARD), jnp.float32)
    params = init_params(k_par)

    out = lstms_forward(seq, params)
    out = jax.block_until_ready(out)

    ref = reference_forward(seq, params)
    assert out.shape == (B, OUT)
    # Tolerance covers the approximate (EUP) reciprocal in the softmax.
    assert jnp.allclose(out, ref, atol=1e-3, rtol=1e-3), "mismatch vs reference"
    assert jnp.allclose(jnp.sum(out, axis=1), 1.0, atol=5e-3)

    print("KERNEL_OK")
</pallas_src>

<mosaic_0001>
module attributes {stable_mosaic.version = 11 : i64} {
  func.func @lstm_head_kernel(%arg0: memref<8x8x64xf32, #tpu.memory_space<vmem>>, %arg1: memref<64x128xf32, #tpu.memory_space<vmem>>, %arg2: memref<32x128xf32, #tpu.memory_space<vmem>>, %arg3: memref<1x128xf32, #tpu.memory_space<vmem>>, %arg4: memref<32x32xf32, #tpu.memory_space<vmem>>, %arg5: memref<1x32xf32, #tpu.memory_space<vmem>>, %arg6: memref<32x64xf32, #tpu.memory_space<vmem>>, %arg7: memref<1x64xf32, #tpu.memory_space<vmem>>, %arg8: memref<8x64xf32, #tpu.memory_space<vmem>>) attributes {dimension_semantics = [], scalar_prefetch = 0 : i64, scratch_operands = 0 : i64, tpu.core_type = #tpu.core_type<tc>} {
    %c0 = arith.constant 0 : index
    %c0_0 = arith.constant 0 : index
    %c0_1 = arith.constant 0 : index
    %0 = vector.load %arg0[%c0, %c0_0, %c0_1] : memref<8x8x64xf32, #tpu.memory_space<vmem>>, vector<8x8x64xf32>
    %1 = vector.shape_cast %0 : vector<8x8x64xf32> to vector<64x64xf32>
    %c0_2 = arith.constant 0 : index
    %c0_3 = arith.constant 0 : index
    %2 = vector.load %arg1[%c0_2, %c0_3] : memref<64x128xf32, #tpu.memory_space<vmem>>, vector<64x128xf32>
    %cst = arith.constant dense<0.000000e+00> : vector<64x128xf32>
    %3 = tpu.matmul %1, %2, %cst {dimension_numbers = #tpu.dot_dimension_numbers<[1], [0], [0], [1], [0, 0, 1, 1], [], []>} : vector<64x64xf32>, vector<64x128xf32>, vector<64x128xf32> -> vector<64x128xf32>
    %c0_4 = arith.constant 0 : index
    %c0_5 = arith.constant 0 : index
    %4 = vector.load %arg3[%c0_4, %c0_5] : memref<1x128xf32, #tpu.memory_space<vmem>>, vector<1x128xf32>
    %5 = vector.broadcast %4 : vector<1x128xf32> to vector<64x128xf32>
    %6 = arith.addf %3, %5 : vector<64x128xf32>
    %c0_6 = arith.constant 0 : index
    %c0_7 = arith.constant 0 : index
    %7 = vector.load %arg2[%c0_6, %c0_7] : memref<32x128xf32, #tpu.memory_space<vmem>>, vector<32x128xf32>
    %cst_8 = arith.constant 0.000000e+00 : f32
    %8 = vector.broadcast %cst_8 : f32 to vector<8x32xf32>
    %cst_9 = arith.constant 0.000000e+00 : f32
    %9 = vector.broadcast %cst_9 : f32 to vector<8x32xf32>
    %10 = vector.extract_strided_slice %6 {offsets = [0, 0], sizes = [8, 128], strides = [1, 1]} : vector<64x128xf32> to vector<8x128xf32>
    %cst_10 = arith.constant dense<0.000000e+00> : vector<8x128xf32>
    %11 = tpu.matmul %8, %7, %cst_10 {dimension_numbers = #tpu.dot_dimension_numbers<[1], [0], [0], [1], [0, 0, 1, 1], [], []>} : vector<8x32xf32>, vector<32x128xf32>, vector<8x128xf32> -> vector<8x128xf32>
    %12 = arith.addf %10, %11 : vector<8x128xf32>
    %13 = arith.negf %12 : vector<8x128xf32>
    %14 = math.exp %13 : vector<8x128xf32>
    %cst_11 = arith.constant 1.000000e+00 : f32
    %15 = vector.broadcast %cst_11 : f32 to vector<8x128xf32>
    %16 = arith.addf %15, %14 : vector<8x128xf32>
    %17 = arith.divf %15, %16 : vector<8x128xf32>
    %18 = math.tanh %12 : vector<8x128xf32>
    %19 = vector.extract_strided_slice %17 {offsets = [0, 0], sizes = [8, 32], strides = [1, 1]} : vector<8x128xf32> to vector<8x32xf32>
    %20 = vector.extract_strided_slice %17 {offsets = [0, 32], sizes = [8, 32], strides = [1, 1]} : vector<8x128xf32> to vector<8x32xf32>
    %21 = vector.extract_strided_slice %18 {offsets = [0, 64], sizes = [8, 32], strides = [1, 1]} : vector<8x128xf32> to vector<8x32xf32>
    %22 = vector.extract_strided_slice %17 {offsets = [0, 96], sizes = [8, 32], strides = [1, 1]} : vector<8x128xf32> to vector<8x32xf32>
    %23 = arith.mulf %20, %9 : vector<8x32xf32>
    %24 = arith.mulf %19, %21 : vector<8x32xf32>
    %25 = arith.addf %23, %24 : vector<8x32xf32>
    %26 = math.tanh %25 : vector<8x32xf32>
    %27 = arith.mulf %22, %26 : vector<8x32xf32>
    %28 = vector.extract_strided_slice %6 {offsets = [8, 0], sizes = [8, 128], strides = [1, 1]} : vector<64x128xf32> to vector<8x128xf32>
    %cst_12 = arith.constant dense<0.000000e+00> : vector<8x128xf32>
    %29 = tpu.matmul %27, %7, %cst_12 {dimension_numbers = #tpu.dot_dimension_numbers<[1], [0], [0], [1], [0, 0, 1, 1], [], []>} : vector<8x32xf32>, vector<32x128xf32>, vector<8x128xf32> -> vector<8x128xf32>
    %30 = arith.addf %28, %29 : vector<8x128xf32>
    %31 = arith.negf %30 : vector<8x128xf32>
    %32 = math.exp %31 : vector<8x128xf32>
    %cst_13 = arith.constant 1.000000e+00 : f32
    %33 = vector.broadcast %cst_13 : f32 to vector<8x128xf32>
    %34 = arith.addf %33, %32 : vector<8x128xf32>
    %35 = arith.divf %33, %34 : vector<8x128xf32>
    %36 = math.tanh %30 : vector<8x128xf32>
    %37 = vector.extract_strided_slice %35 {offsets = [0, 0], sizes = [8, 32], strides = [1, 1]} : vector<8x128xf32> to vector<8x32xf32>
    %38 = vector.extract_strided_slice %35 {offsets = [0, 32], sizes = [8, 32], strides = [1, 1]} : vector<8x128xf32> to vector<8x32xf32>
    %39 = vector.extract_strided_slice %36 {offsets = [0, 64], sizes = [8, 32], strides = [1, 1]} : vector<8x128xf32> to vector<8x32xf32>
    %40 = vector.extract_strided_slice %35 {offsets = [0, 96], sizes = [8, 32], strides = [1, 1]} : vector<8x128xf32> to vector<8x32xf32>
    %41 = arith.mulf %38, %25 : vector<8x32xf32>
    %42 = arith.mulf %37, %39 : vector<8x32xf32>
    %43 = arith.addf %41, %42 : vector<8x32xf32>
    %44 = math.tanh %43 : vector<8x32xf32>
    %45 = arith.mulf %40, %44 : vector<8x32xf32>
    %46 = vector.extract_strided_slice %6 {offsets = [16, 0], sizes = [8, 128], strides = [1, 1]} : vector<64x128xf32> to vector<8x128xf32>
    %cst_14 = arith.constant dense<0.000000e+00> : vector<8x128xf32>
    %47 = tpu.matmul %45, %7, %cst_14 {dimension_numbers = #tpu.dot_dimension_numbers<[1], [0], [0], [1], [0, 0, 1, 1], [], []>} : vector<8x32xf32>, vector<32x128xf32>, vector<8x128xf32> -> vector<8x128xf32>
    %48 = arith.addf %46, %47 : vector<8x128xf32>
    %49 = arith.negf %48 : vector<8x128xf32>
    %50 = math.exp %49 : vector<8x128xf32>
    %cst_15 = arith.constant 1.000000e+00 : f32
    %51 = vector.broadcast %cst_15 : f32 to vector<8x128xf32>
    %52 = arith.addf %51, %50 : vector<8x128xf32>
    %53 = arith.divf %51, %52 : vector<8x128xf32>
    %54 = math.tanh %48 : vector<8x128xf32>
    %55 = vector.extract_strided_slice %53 {offsets = [0, 0], sizes = [8, 32], strides = [1, 1]} : vector<8x128xf32> to vector<8x32xf32>
    %56 = vector.extract_strided_slice %53 {offsets = [0, 32], sizes = [8, 32], strides = [1, 1]} : vector<8x128xf32> to vector<8x32xf32>
    %57 = vector.extract_strided_slice %54 {offsets = [0, 64], sizes = [8, 32], strides = [1, 1]} : vector<8x128xf32> to vector<8x32xf32>
    %58 = vector.extract_strided_slice %53 {offsets = [0, 96], sizes = [8, 32], strides = [1, 1]} : vector<8x128xf32> to vector<8x32xf32>
    %59 = arith.mulf %56, %43 : vector<8x32xf32>
    %60 = arith.mulf %55, %57 : vector<8x32xf32>
    %61 = arith.addf %59, %60 : vector<8x32xf32>
    %62 = math.tanh %61 : vector<8x32xf32>
    %63 = arith.mulf %58, %62 : vector<8x32xf32>
    %64 = vector.extract_strided_slice %6 {offsets = [24, 0], sizes = [8, 128], strides = [1, 1]} : vector<64x128xf32> to vector<8x128xf32>
    %cst_16 = arith.constant dense<0.000000e+00> : vector<8x128xf32>
    %65 = tpu.matmul %63, %7, %cst_16 {dimension_numbers = #tpu.dot_dimension_numbers<[1], [0], [0], [1], [0, 0, 1, 1], [], []>} : vector<8x32xf32>, vector<32x128xf32>, vector<8x128xf32> -> vector<8x128xf32>
    %66 = arith.addf %64, %65 : vector<8x128xf32>
    %67 = arith.negf %66 : vector<8x128xf32>
    %68 = math.exp %67 : vector<8x128xf32>
    %cst_17 = arith.constant 1.000000e+00 : f32
    %69 = vector.broadcast %cst_17 : f32 to vector<8x128xf32>
    %70 = arith.addf %69, %68 : vector<8x128xf32>
    %71 = arith.divf %69, %70 : vector<8x128xf32>
    %72 = math.tanh %66 : vector<8x128xf32>
    %73 = vector.extract_strided_slice %71 {offsets = [0, 0], sizes = [8, 32], strides = [1, 1]} : vector<8x128xf32> to vector<8x32xf32>
    %74 = vector.extract_strided_slice %71 {offsets = [0, 32], sizes = [8, 32], strides = [1, 1]} : vector<8x128xf32> to vector<8x32xf32>
    %75 = vector.extract_strided_slice %72 {offsets = [0, 64], sizes = [8, 32], strides = [1, 1]} : vector<8x128xf32> to vector<8x32xf32>
    %76 = vector.extract_strided_slice %71 {offsets = [0, 96], sizes = [8, 32], strides = [1, 1]} : vector<8x128xf32> to vector<8x32xf32>
    %77 = arith.mulf %74, %61 : vector<8x32xf32>
    %78 = arith.mulf %73, %75 : vector<8x32xf32>
    %79 = arith.addf %77, %78 : vector<8x32xf32>
    %80 = math.tanh %79 : vector<8x32xf32>
    %81 = arith.mulf %76, %80 : vector<8x32xf32>
    %82 = vector.extract_strided_slice %6 {offsets = [32, 0], sizes = [8, 128], strides = [1, 1]} : vector<64x128xf32> to vector<8x128xf32>
    %cst_18 = arith.constant dense<0.000000e+00> : vector<8x128xf32>
    %83 = tpu.matmul %81, %7, %cst_18 {dimension_numbers = #tpu.dot_dimension_numbers<[1], [0], [0], [1], [0, 0, 1, 1], [], []>} : vector<8x32xf32>, vector<32x128xf32>, vector<8x128xf32> -> vector<8x128xf32>
    %84 = arith.addf %82, %83 : vector<8x128xf32>
    %85 = arith.negf %84 : vector<8x128xf32>
    %86 = math.exp %85 : vector<8x128xf32>
    %cst_19 = arith.constant 1.000000e+00 : f32
    %87 = vector.broadcast %cst_19 : f32 to vector<8x128xf32>
    %88 = arith.addf %87, %86 : vector<8x128xf32>
    %89 = arith.divf %87, %88 : vector<8x128xf32>
    %90 = math.tanh %84 : vector<8x128xf32>
    %91 = vector.extract_strided_slice %89 {offsets = [0, 0], sizes = [8, 32], strides = [1, 1]} : vector<8x128xf32> to vector<8x32xf32>
    %92 = vector.extract_strided_slice %89 {offsets = [0, 32], sizes = [8, 32], strides = [1, 1]} : vector<8x128xf32> to vector<8x32xf32>
    %93 = vector.extract_strided_slice %90 {offsets = [0, 64], sizes = [8, 32], strides = [1, 1]} : vector<8x128xf32> to vector<8x32xf32>
    %94 = vector.extract_strided_slice %89 {offsets = [0, 96], sizes = [8, 32], strides = [1, 1]} : vector<8x128xf32> to vector<8x32xf32>
    %95 = arith.mulf %92, %79 : vector<8x32xf32>
    %96 = arith.mulf %91, %93 : vector<8x32xf32>
    %97 = arith.addf %95, %96 : vector<8x32xf32>
    %98 = math.tanh %97 : vector<8x32xf32>
    %99 = arith.mulf %94, %98 : vector<8x32xf32>
    %100 = vector.extract_strided_slice %6 {offsets = [40, 0], sizes = [8, 128], strides = [1, 1]} : vector<64x128xf32> to vector<8x128xf32>
    %cst_20 = arith.constant dense<0.000000e+00> : vector<8x128xf32>
    %101 = tpu.matmul %99, %7, %cst_20 {dimension_numbers = #tpu.dot_dimension_numbers<[1], [0], [0], [1], [0, 0, 1, 1], [], []>} : vector<8x32xf32>, vector<32x128xf32>, vector<8x128xf32> -> vector<8x128xf32>
    %102 = arith.addf %100, %101 : vector<8x128xf32>
    %103 = arith.negf %102 : vector<8x128xf32>
    %104 = math.exp %103 : vector<8x128xf32>
    %cst_21 = arith.constant 1.000000e+00 : f32
    %105 = vector.broadcast %cst_21 : f32 to vector<8x128xf32>
    %106 = arith.addf %105, %104 : vector<8x128xf32>
    %107 = arith.divf %105, %106 : vector<8x128xf32>
    %108 = math.tanh %102 : vector<8x128xf32>
    %109 = vector.extract_strided_slice %107 {offsets = [0, 0], sizes = [8, 32], strides = [1, 1]} : vector<8x128xf32> to vector<8x32xf32>
    %110 = vector.extract_strided_slice %107 {offsets = [0, 32], sizes = [8, 32], strides = [1, 1]} : vector<8x128xf32> to vector<8x32xf32>
    %111 = vector.extract_strided_slice %108 {offsets = [0, 64], sizes = [8, 32], strides = [1, 1]} : vector<8x128xf32> to vector<8x32xf32>
    %112 = vector.extract_strided_slice %107 {offsets = [0, 96], sizes = [8, 32], strides = [1, 1]} : vector<8x128xf32> to vector<8x32xf32>
    %113 = arith.mulf %110, %97 : vector<8x32xf32>
    %114 = arith.mulf %109, %111 : vector<8x32xf32>
    %115 = arith.addf %113, %114 : vector<8x32xf32>
    %116 = math.tanh %115 : vector<8x32xf32>
    %117 = arith.mulf %112, %116 : vector<8x32xf32>
    %118 = vector.extract_strided_slice %6 {offsets = [48, 0], sizes = [8, 128], strides = [1, 1]} : vector<64x128xf32> to vector<8x128xf32>
    %cst_22 = arith.constant dense<0.000000e+00> : vector<8x128xf32>
    %119 = tpu.matmul %117, %7, %cst_22 {dimension_numbers = #tpu.dot_dimension_numbers<[1], [0], [0], [1], [0, 0, 1, 1], [], []>} : vector<8x32xf32>, vector<32x128xf32>, vector<8x128xf32> -> vector<8x128xf32>
    %120 = arith.addf %118, %119 : vector<8x128xf32>
    %121 = arith.negf %120 : vector<8x128xf32>
    %122 = math.exp %121 : vector<8x128xf32>
    %cst_23 = arith.constant 1.000000e+00 : f32
    %123 = vector.broadcast %cst_23 : f32 to vector<8x128xf32>
    %124 = arith.addf %123, %122 : vector<8x128xf32>
    %125 = arith.divf %123, %124 : vector<8x128xf32>
    %126 = math.tanh %120 : vector<8x128xf32>
    %127 = vector.extract_strided_slice %125 {offsets = [0, 0], sizes = [8, 32], strides = [1, 1]} : vector<8x128xf32> to vector<8x32xf32>
    %128 = vector.extract_strided_slice %125 {offsets = [0, 32], sizes = [8, 32], strides = [1, 1]} : vector<8x128xf32> to vector<8x32xf32>
    %129 = vector.extract_strided_slice %126 {offsets = [0, 64], sizes = [8, 32], strides = [1, 1]} : vector<8x128xf32> to vector<8x32xf32>
    %130 = vector.extract_strided_slice %125 {offsets = [0, 96], sizes = [8, 32], strides = [1, 1]} : vector<8x128xf32> to vector<8x32xf32>
    %131 = arith.mulf %128, %115 : vector<8x32xf32>
    %132 = arith.mulf %127, %129 : vector<8x32xf32>
    %133 = arith.addf %131, %132 : vector<8x32xf32>
    %134 = math.tanh %133 : vector<8x32xf32>
    %135 = arith.mulf %130, %134 : vector<8x32xf32>
    %136 = vector.extract_strided_slice %6 {offsets = [56, 0], sizes = [8, 128], strides = [1, 1]} : vector<64x128xf32> to vector<8x128xf32>
    %cst_24 = arith.constant dense<0.000000e+00> : vector<8x128xf32>
    %137 = tpu.matmul %135, %7, %cst_24 {dimension_numbers = #tpu.dot_dimension_numbers<[1], [0], [0], [1], [0, 0, 1, 1], [], []>} : vector<8x32xf32>, vector<32x128xf32>, vector<8x128xf32> -> vector<8x128xf32>
    %138 = arith.addf %136, %137 : vector<8x128xf32>
    %139 = arith.negf %138 : vector<8x128xf32>
    %140 = math.exp %139 : vector<8x128xf32>
    %cst_25 = arith.constant 1.000000e+00 : f32
    %141 = vector.broadcast %cst_25 : f32 to vector<8x128xf32>
    %142 = arith.addf %141, %140 : vector<8x128xf32>
    %143 = arith.divf %141, %142 : vector<8x128xf32>
    %144 = math.tanh %138 : vector<8x128xf32>
    %145 = vector.extract_strided_slice %143 {offsets = [0, 0], sizes = [8, 32], strides = [1, 1]} : vector<8x128xf32> to vector<8x32xf32>
    %146 = vector.extract_strided_slice %143 {offsets = [0, 32], sizes = [8, 32], strides = [1, 1]} : vector<8x128xf32> to vector<8x32xf32>
    %147 = vector.extract_strided_slice %144 {offsets = [0, 64], sizes = [8, 32], strides = [1, 1]} : vector<8x128xf32> to vector<8x32xf32>
    %148 = vector.extract_strided_slice %143 {offsets = [0, 96], sizes = [8, 32], strides = [1, 1]} : vector<8x128xf32> to vector<8x32xf32>
    %149 = arith.mulf %146, %133 : vector<8x32xf32>
    %150 = arith.mulf %145, %147 : vector<8x32xf32>
    %151 = arith.addf %149, %150 : vector<8x32xf32>
    %152 = math.tanh %151 : vector<8x32xf32>
    %153 = arith.mulf %148, %152 : vector<8x32xf32>
    %cst_26 = arith.constant 0.000000e+00 : f32
    %154 = vector.broadcast %cst_26 : f32 to vector<8x32xf32>
    %155 = arith.maximumf %153, %154 : vector<8x32xf32>
    %c0_27 = arith.constant 0 : index
    %c0_28 = arith.constant 0 : index
    %156 = vector.load %arg4[%c0_27, %c0_28] : memref<32x32xf32, #tpu.memory_space<vmem>>, vector<32x32xf32>
    %cst_29 = arith.constant dense<0.000000e+00> : vector<8x32xf32>
    %157 = tpu.matmul %155, %156, %cst_29 {dimension_numbers = #tpu.dot_dimension_numbers<[1], [0], [0], [1], [0, 0, 1, 1], [], []>} : vector<8x32xf32>, vector<32x32xf32>, vector<8x32xf32> -> vector<8x32xf32>
    %c0_30 = arith.constant 0 : index
    %c0_31 = arith.constant 0 : index
    %158 = vector.load %arg5[%c0_30, %c0_31] : memref<1x32xf32, #tpu.memory_space<vmem>>, vector<1x32xf32>
    %159 = vector.broadcast %158 : vector<1x32xf32> to vector<8x32xf32>
    %160 = arith.addf %157, %159 : vector<8x32xf32>
    %cst_32 = arith.constant 0.000000e+00 : f32
    %161 = vector.broadcast %cst_32 : f32 to vector<8x32xf32>
    %162 = arith.maximumf %160, %161 : vector<8x32xf32>
    %c0_33 = arith.constant 0 : index
    %c0_34 = arith.constant 0 : index
    %163 = vector.load %arg6[%c0_33, %c0_34] : memref<32x64xf32, #tpu.memory_space<vmem>>, vector<32x64xf32>
    %cst_35 = arith.constant dense<0.000000e+00> : vector<8x64xf32>
    %164 = tpu.matmul %162, %163, %cst_35 {dimension_numbers = #tpu.dot_dimension_numbers<[1], [0], [0], [1], [0, 0, 1, 1], [], []>} : vector<8x32xf32>, vector<32x64xf32>, vector<8x64xf32> -> vector<8x64xf32>
    %c0_36 = arith.constant 0 : index
    %c0_37 = arith.constant 0 : index
    %165 = vector.load %arg7[%c0_36, %c0_37] : memref<1x64xf32, #tpu.memory_space<vmem>>, vector<1x64xf32>
    %166 = vector.broadcast %165 : vector<1x64xf32> to vector<8x64xf32>
    %167 = arith.addf %164, %166 : vector<8x64xf32>
    %cst_38 = arith.constant dense<0xFF800000> : vector<8xf32>
    %168 = vector.multi_reduction <maximumf>, %167, %cst_38 [1] : vector<8x64xf32> to vector<8xf32>
    %169 = vector.shape_cast %168 : vector<8xf32> to vector<8x1xf32>
    %170 = vector.broadcast %169 : vector<8x1xf32> to vector<8x64xf32>
    %171 = arith.subf %167, %170 : vector<8x64xf32>
    %172 = math.exp %171 : vector<8x64xf32>
    %cst_39 = arith.constant dense<0.000000e+00> : vector<8xf32>
    %173 = vector.multi_reduction <add>, %172, %cst_39 [1] : vector<8x64xf32> to vector<8xf32>
    %174 = vector.shape_cast %173 : vector<8xf32> to vector<8x1xf32>
    %175 = tpu.reciprocal %174 {approx = true} : vector<8x1xf32> -> vector<8x1xf32>
    %176 = vector.broadcast %175 : vector<8x1xf32> to vector<8x64xf32>
    %177 = arith.mulf %172, %176 : vector<8x64xf32>
    %c0_40 = arith.constant 0 : index
    %c0_41 = arith.constant 0 : index
    %178 = vector.load %arg8[%c0_40, %c0_41] : memref<8x64xf32, #tpu.memory_space<vmem>>, vector<8x64xf32>
    tpu.vector_store %arg8[%c0_40, %c0_41], %177 {strides = array<i32>} : memref<8x64xf32, #tpu.memory_space<vmem>>, vector<8x64xf32>,
    return
  }
}

</mosaic_0001>

<bundles_post_ra>
// kernel: lstms_forward.1
= control target key start
LH: loop header
LB: loop body
LE: loop exit
PB: predicated region body
PF: predicated region fallthrough
CT: control target
= control target key end

     0   :  { %v1554_v3 = vmov 0.0|0.0   ;;  %vm1555_vm0 = vmmov 0   ;;  %v1556_v4 = vmov 0.0   ;;  %vm52_vm1 = vcmask 523264   ;;  %s1557_s11 = smov 64   ;;  %s1832_s1 = inlined_call_operand.vmem [shape: f32[64,128], index: 1, kind: input, shape index: {}]   ;;  %s1833_s2 = inlined_call_operand.vmem [shape: f32[32,128], index: 2, kind: input, shape index: {}]   ;;  %s1834_s0 = inlined_call_operand.vmem [shape: f32[8,8,64], index: 0, kind: input, shape index: {}]   ;;  %s1835_s3 = inlined_call_operand.vmem [shape: f32[1,128], index: 3, kind: input, shape index: {}]   ;;  %s1836_s4 = inlined_call_operand.vmem [shape: f32[32,32], index: 4, kind: input, shape index: {}]   ;;  %s1837_s6 = inlined_call_operand.vmem [shape: f32[32,64], index: 6, kind: input, shape index: {}]   ;;  %s1838_s5 = inlined_call_operand.vmem [shape: f32[1,32], index: 5, kind: input, shape index: {}]   ;;  %s1839_s7 = inlined_call_operand.vmem [shape: f32[1,64], index: 7, kind: input, shape index: {}]   ;;  %s1840_s8 = inlined_call_operand.vmem [shape: f32[8,64], index: 8, kind: output, shape index: {}]  }
   0x1   :  { %v37_v0 = vld [vmem:[%s1832_s1] sm:$0xff]  ;;  %v38_v1 = vld [vmem:[%s1832_s1 + $0x8] sm:$0xff]  ;;  %v39_v2 = vld [vmem:[%s1832_s1 + $0x10] sm:$0xff]  ;;  %1421 = vmatprep.subr.bf16.mxu1 %v1554_v3  ;;  %1303 = vmatprep.mubr.msk.f32.mxu1 %vm1555_vm0, %v1556_v4  ;;  %vm186_vm2 = vcmask 261120  }
   0x2   :  { %v1405_v5 = vpack.c.bf16 %v38_v1, %v37_v0  ;;  %v40_v6 = vld [vmem:[%s1832_s1 + $0x18] sm:$0xff]  ;;  %v41_v7 = vld [vmem:[%s1832_s1 + $0x20] sm:$0xff]  ;;  %v42_v9 = vld [vmem:[%s1832_s1 + $0x28] sm:$0xff] }
   0x3   :  { %v1409_v8 = vpack.c.bf16 %v40_v6, %v39_v2  ;;  %v182_v10 = vld [vmem:[%s1833_s2] sm:$0xff]  ;;  %v183_v11 = vld [vmem:[%s1833_s2 + $0x8] sm:$0xff]  ;;  %v184_v14 = vld [vmem:[%s1833_s2 + $0x10] sm:$0xff]  ;;  %v1413_v16 = vpack.c.bf16 %v42_v9, %v41_v7 }
   0x4   :  { %1406 = vmatprep.subr.bf16.mxu0 %v1405_v5  ;;  %v1631_v12 = vpack.c.bf16 %v183_v11, %v182_v10  ;;  %v29_v13 = vld [vmem:[%s1834_s0] sm:$0xff]  ;;  %v185_v15 = vld [vmem:[%s1833_s2 + $0x18] sm:$0xff]  ;;  %v43_v18 = vld [vmem:[%s1832_s1 + $0x30] sm:$0xff] }
   0x5   :  { %1408 = vmatpush3.bf16.msra.mxu0 %v1405_v5  ;;  %1283 = vmatprep.mubr.msk.f32.mxu0 %vm52_vm1, %v29_v13  ;;  %v1644_v17 = vpack.c.bf16 %v185_v15, %v184_v14  ;;  %v44_v19 = vld [vmem:[%s1832_s1 + $0x38] sm:$0xff]  ;;  %v30_v21 = vld [vmem:[%s1834_s0 + $0x8] sm:$0xff]  ;;  %v1674_v24 = vld [vmem:[%s1835_s3] ss:$0 sm:$0xff]  ;;  %s1558_s3 = smov 32  }
   0x6   :  { %1410 = vmatprep.subr.bf16.mxu0 %v1409_v8  ;;  %1423 = vmatpush3.bf16.msra.mxu1 %v1631_v12  ;;  %v1417_v20 = vpack.c.bf16 %v44_v19, %v43_v18  ;;  %v31_v57 = vld [vmem:[%s1834_s0 + $0x10] sm:$0xff]  ;;  %v32_v58 = vld [vmem:[%s1834_s0 + $0x18] sm:$0xff]  ;;  %v33_v19 = vld [vmem:[%s1834_s0 + $0x20] sm:$0xff] }
   0x7   :  { %1424 = vmatprep.subr.bf16.mxu1 %v1554_v3 }
   0x9   :  { %1412 = vmatpush3.bf16.msra.mxu0 %v1409_v8 }
   0xa   :  { %1414 = vmatprep.subr.bf16.mxu0 %v1413_v16  ;;  %1426 = vmatpush3.bf16.msra.mxu1 %v1644_v17 }
   0xb   :  { %1427 = vmatprep.subr.bf16.mxu1 %v1554_v3 }
   0xd   :  { %1416 = vmatpush3.bf16.msra.mxu0 %v1413_v16  ;;  %1304 = vmatmul.mubr.f32.vlgmr.msra.gmra.mrb[0].mxu1 %v1556_v4 }
   0xe   :  { %1418 = vmatprep.subr.bf16.mxu0 %v1417_v20  ;;  %1429 = vmatpush3.bf16.msra.mxu1 %v1631_v12 }
   0xf   :  { %1430 = vmatprep.subr.bf16.mxu1 %v1554_v3  ;;  %1314 = vmatprep.mubr.msk.f32.mxu1 %vm1555_vm0, %v1556_v4 }
  0x11   :  { %1420 = vmatpush3.bf16.msra.mxu0 %v1417_v20  ;;  %v34_v20 = vld [vmem:[%s1834_s0 + $0x28] sm:$0xff] }
  0x12   :  { %1432 = vmatpush3.bf16.msra.mxu1 %v1644_v17  ;;  %1439 = vmatprep.subr.bf16.mxu0 %v1554_v3 }
  0x13   :  { %1433 = vmatprep.subr.bf16.mxu1 %v1554_v3 }
  0x14   :  { %1284 = vmatmul.mubr.msk.f32.vlgmr.msra.gmra.mrb[0].mxu0 %vm52_vm1, %v30_v21  ;;  %v35_v21 = vld [vmem:[%s1834_s0 + $0x30] sm:$0xff] }
  0x15   :  { %1441 = vmatpush3.bf16.msra.mxu0 %v1631_v12  ;;  %1286 = vmatprep.mubr.msk.f32.mxu0 %vm52_vm1, %v31_v57 }
  0x16   :  { %1442 = vmatprep.subr.bf16.mxu0 %v1554_v3 }
  0x18   :  { %1287 = vmatmul.mubr.msk.f32.gmra.mrb[2].mxu0 %vm52_vm1, %v32_v58 }
  0x19   :  { %1444 = vmatpush3.bf16.msra.mxu0 %v1644_v17  ;;  %1289 = vmatprep.mubr.msk.f32.mxu0 %vm52_vm1, %v33_v19 }
  0x1a   :  { %1451 = vmatprep.subr.bf16.mxu0 %v1554_v3 }
  0x1c   :  { %1290 = vmatmul.mubr.msk.f32.gmra.mrb[4].mxu0 %vm52_vm1, %v34_v20 }
  0x1d   :  { %1292 = vmatprep.mubr.msk.f32.mxu0 %vm52_vm1, %v35_v21 }
  0xe0   :  { %v256_v22 = vpop.f32.mrb[0].mxu1 }
  0xe1   :  { %v1305_v23 = vpop.f32.mrb[1].mxu1 }
  0xe7   :  { %v1285_v25 = vpop.f32.mrb[0].mxu0 }
  0xe8   :  { %v143_v26 = vpop.f32.mrb[1].mxu0  ;;  %v149_v43 = vadd.f32 %v1285_v25, %v1674_v24 }
  0xe9   :  { %v144_v27 = vadd.f32 %v1674_v24, %v143_v26 }
  0xeb   :  { %v260_v28 = vadd.f32 %v256_v22, %v144_v27  ;;  %v1288_v62 = vpop.f32.mrb[2].mxu0  ;;  %v36_v22 = vld [vmem:[%s1834_s0 + $0x38] sm:$0xff] }
  0xec   :  { %v153_v63 = vpop.f32.mrb[3].mxu0  ;;  %1293 = vmatmul.mubr.msk.f32.gmra.mrb[6].mxu0 %vm52_vm1, %v36_v22 }
  0xed   :  { %1486 = vtanh.f32 %v260_v28  ;;  %v1182_v30 = vmul.f32 -1.442695, %v260_v28  ;;  %v154_v1 = vadd.f32 %v1674_v24, %v153_v63  ;;  %1336 = vmatprep.mubr.msk.f32.mxu0 %vm1555_vm0, %v1556_v4 }
  0xef   :  { %1488 = vpow2.f32 %v1182_v30  ;;  %v1731_v27 = vpop.f32.mrb[4].mxu0 }
  0xf0   :  { %v163_v28 = vpop.f32.mrb[5].mxu0 }
  0xf7   :  { %v1487_v29 = vpop.eup %1486 }
  0xf8   :  { %270 = vrot.lane.b32.xlu0 %v1487_v29, %s1557_s11 }
  0xf9   :  { %v1489_v31 = vpop.eup %1488 }
  0xfa   :  { %v264_v32 = vadd.f32 1.0, %v1489_v31 }
  0xfc   :  { %1490 = vrcp.f32 %v264_v32  ;;  %v159_v32 = vadd.f32 %v1288_v62, %v1674_v24 }
 0x106   :  { %v1491_v33 = vpop.eup %1490 }
 0x107   :  { %v268_v36 = vmul.f32 0.0, %v1491_v33 }
 0x16a   :  { %v271_v34 = vpop.permute.xlu0 %270 }
 0x16b   :  { %v273_v35 = vmul.f32 %v1491_v33, %v271_v34 }
 0x16d   :  { %275 = vrot.lane.b32.xlu0 %v273_v35, %s1558_s3 }
 0x1bf   :  { %v1733_v29 = vpop.f32.mrb[6].mxu0 }
 0x1c0   :  { %v1735_v30 = vpop.f32.mrb[7].mxu0 }
 0x1df   :  { %v276_v37 = vpop.permute.xlu0 %275 }
 0x1e0   :  { %v278_v38 = vadd.f32 %v276_v37, %v268_v36 }
 0x1e2   :  { %1492 = vtanh.f32 %v278_v38 }
 0x1ec   :  { %v1493_v39 = vpop.eup %1492 }
 0x1ed   :  { %281 = vrot.lane.b32.xlu1 %v1493_v39, %s1557_s11 }
 0x25f   :  { %v282_v40 = vpop.permute.xlu1 %281 }
 0x260   :  { %v284_v41 = vmul.f32 %v1491_v33, %v282_v40 }
 0x262   :  { %286 = vrot.lane.b32.xlu1 %v284_v41, %s1558_s3 }
 0x2d4   :  { %v287_v42 = vpop.permute.xlu1 %286 }
 0x2d5   :  { %1315 = vmatmul.mubr.msk.f32.vlgmr.msra.gmra.mrb[2].mxu1 %vm186_vm2, %v287_v42 }
 0x2d6   :  { %1435 = vmatpush3.bf16.msra.mxu1 %v1631_v12  ;;  %1325 = vmatprep.mubr.msk.f32.mxu1 %vm1555_vm0, %v1556_v4 }
 0x2d7   :  { %1436 = vmatprep.subr.bf16.mxu1 %v1554_v3 }
 0x2da   :  { %1438 = vmatpush3.bf16.msra.mxu1 %v1644_v17 }
 0x2db   :  { %1445 = vmatprep.subr.bf16.mxu1 %v1554_v3 }
 0x3a8   :  { %v356_v44 = vpop.f32.mrb[2].mxu1 }
 0x3a9   :  { %v360_v45 = vadd.f32 %v356_v44, %v149_v43  ;;  %v1316_v46 = vpop.f32.mrb[3].mxu1 }
 0x3ab   :  { %1494 = vtanh.f32 %v360_v45  ;;  %v1184_v48 = vmul.f32 -1.442695, %v360_v45 }
 0x3ad   :  { %1496 = vpow2.f32 %v1184_v48 }
 0x3b5   :  { %v1495_v47 = vpop.eup %1494 }
 0x3b6   :  { %370 = vrot.lane.b32.xlu0 %v1495_v47, %s1557_s11 }
 0x3b7   :  { %v1497_v49 = vpop.eup %1496 }
 0x3b8   :  { %v364_v50 = vadd.f32 1.0, %v1497_v49 }
 0x3ba   :  { %1498 = vrcp.f32 %v364_v50  ;;  %v164_v50 = vadd.f32 %v1674_v24, %v163_v28 }
 0x3c4   :  { %v1499_v51 = vpop.eup %1498 }
 0x3c5   :  { %v368_v54 = vmul.f32 %v1499_v51, %v278_v38 }
 0x428   :  { %v371_v52 = vpop.permute.xlu0 %370 }
 0x429   :  { %v373_v53 = vmul.f32 %v1499_v51, %v371_v52 }
 0x42b   :  { %375 = vrot.lane.b32.xlu1 %v373_v53, %s1558_s3 }
 0x49d   :  { %v376_v55 = vpop.permute.xlu1 %375 }
 0x49e   :  { %v378_v56 = vadd.f32 %v376_v55, %v368_v54 }
 0x4a0   :  { %1500 = vtanh.f32 %v378_v56 }
 0x4aa   :  { %v1501_v59 = vpop.eup %1500 }
 0x4ab   :  { %381 = vrot.lane.b32.xlu0 %v1501_v59, %s1557_s11 }
 0x51d   :  { %v382_v60 = vpop.permute.xlu0 %381 }
 0x51e   :  { %v384_v61 = vmul.f32 %v1499_v51, %v382_v60 }
 0x520   :  { %386 = vrot.lane.b32.xlu1 %v384_v61, %s1558_s3 }
 0x592   :  { %v387_v0 = vpop.permute.xlu1 %386 }
 0x593   :  { %1326 = vmatmul.mubr.msk.f32.vlgmr.msra.gmra.mrb[4].mxu1 %vm186_vm2, %v387_v0 }
 0x594   :  { %1447 = vmatpush3.bf16.msra.mxu1 %v1631_v12  ;;  %1347 = vmatprep.mubr.msk.f32.mxu1 %vm1555_vm0, %v1556_v4 }
 0x595   :  { %1448 = vmatprep.subr.bf16.mxu1 %v1554_v3 }
 0x598   :  { %1450 = vmatpush3.bf16.msra.mxu1 %v1644_v17 }
 0x599   :  { %1457 = vmatprep.subr.bf16.mxu1 %v1554_v3 }
 0x666   :  { %v456_v2 = vpop.f32.mrb[4].mxu1 }
 0x667   :  { %v460_v5 = vadd.f32 %v456_v2, %v154_v1  ;;  %v1327_v6 = vpop.f32.mrb[5].mxu1 }
 0x668   :  { %v169_v6 = vadd.f32 %v1731_v27, %v1674_v24 }
 0x669   :  { %1502 = vtanh.f32 %v460_v5  ;;  %v1186_v8 = vmul.f32 -1.442695, %v460_v5 }
 0x66b   :  { %1504 = vpow2.f32 %v1186_v8 }
 0x673   :  { %v1503_v7 = vpop.eup %1502 }
 0x674   :  { %470 = vrot.lane.b32.xlu0 %v1503_v7, %s1557_s11 }
 0x675   :  { %v1505_v9 = vpop.eup %1504 }
 0x676   :  { %v464_v10 = vadd.f32 1.0, %v1505_v9 }
 0x678   :  { %1506 = vrcp.f32 %v464_v10 }
 0x682   :  { %v1507_v11 = vpop.eup %1506 }
 0x683   :  { %v468_v15 = vmul.f32 %v1507_v11, %v378_v56 }
 0x6e6   :  { %v471_v13 = vpop.permute.xlu0 %470 }
 0x6e7   :  { %v473_v14 = vmul.f32 %v1507_v11, %v471_v13 }
 0x6e9   :  { %475 = vrot.lane.b32.xlu1 %v473_v14, %s1558_s3 }
 0x75b   :  { %v476_v16 = vpop.permute.xlu1 %475 }
 0x75c   :  { %v478_v18 = vadd.f32 %v476_v16, %v468_v15 }
 0x75e   :  { %1508 = vtanh.f32 %v478_v18 }
 0x768   :  { %v1509_v23 = vpop.eup %1508 }
 0x769   :  { %481 = vrot.lane.b32.xlu0 %v1509_v23, %s1557_s11 }
 0x7db   :  { %v482_v25 = vpop.permute.xlu0 %481 }
 0x7dc   :  { %v484_v26 = vmul.f32 %v1507_v11, %v482_v25  ;;  %v174_v25 = vadd.f32 %v1674_v24, %v1735_v30 }
 0x7de   :  { %486 = vrot.lane.b32.xlu1 %v484_v26, %s1558_s3 }
 0x850   :  { %v487_v31 = vpop.permute.xlu1 %486 }
 0x851   :  { %1337 = vmatmul.mubr.msk.f32.vlgmr.msra.gmra.mrb[8].mxu0 %vm186_vm2, %v487_v31 }
 0x852   :  { %1453 = vmatpush3.bf16.msra.mxu0 %v1631_v12  ;;  %1358 = vmatprep.mubr.msk.f32.mxu0 %vm1555_vm0, %v1556_v4 }
 0x853   :  { %1454 = vmatprep.subr.bf16.mxu0 %v1554_v3 }
 0x856   :  { %1456 = vmatpush3.bf16.msra.mxu0 %v1644_v17 }
 0x857   :  { %1463 = vmatprep.subr.bf16.mxu0 %v1554_v3 }
 0x924   :  { %v556_v33 = vpop.f32.mrb[8].mxu0 }
 0x925   :  { %v560_v34 = vadd.f32 %v556_v33, %v159_v32  ;;  %v1338_v35 = vpop.f32.mrb[9].mxu0 }
 0x927   :  { %1510 = vtanh.f32 %v560_v34  ;;  %v1188_v37 = vmul.f32 -1.442695, %v560_v34 }
 0x929   :  { %1512 = vpow2.f32 %v1188_v37 }
 0x931   :  { %v1511_v36 = vpop.eup %1510 }
 0x932   :  { %570 = vrot.lane.b32.xlu0 %v1511_v36, %s1557_s11 }
 0x933   :  { %v1513_v38 = vpop.eup %1512 }
 0x934   :  { %v564_v39 = vadd.f32 1.0, %v1513_v38 }
 0x936   :  { %1514 = vrcp.f32 %v564_v39 }
 0x940   :  { %v1515_v40 = vpop.eup %1514 }
 0x941   :  { %v568_v43 = vmul.f32 %v1515_v40, %v478_v18 }
 0x9a4   :  { %v571_v41 = vpop.permute.xlu0 %570 }
 0x9a5   :  { %v573_v42 = vmul.f32 %v1515_v40, %v571_v41 }
 0x9a7   :  { %575 = vrot.lane.b32.xlu1 %v573_v42, %s1558_s3 }
 0xa19   :  { %v576_v44 = vpop.permute.xlu1 %575 }
 0xa1a   :  { %v578_v45 = vadd.f32 %v576_v44, %v568_v43  ;;  %v179_v44 = vadd.f32 %v1733_v29, %v1674_v24  ;;  %v986_v29 = vld [vmem:[%s1836_s4] sm:$0xff] }
 0xa1c   :  { %1516 = vtanh.f32 %v578_v45 }
 0xa26   :  { %v1517_v46 = vpop.eup %1516 }
 0xa27   :  { %581 = vrot.lane.b32.xlu0 %v1517_v46, %s1557_s11 }
 0xa99   :  { %v582_v47 = vpop.permute.xlu0 %581 }
 0xa9a   :  { %v584_v48 = vmul.f32 %v1515_v40, %v582_v47 }
 0xa9c   :  { %586 = vrot.lane.b32.xlu1 %v584_v48, %s1558_s3 }
 0xb0e   :  { %v587_v49 = vpop.permute.xlu1 %586 }
 0xb0f   :  { %1348 = vmatmul.mubr.msk.f32.vlgmr.msra.gmra.mrb[6].mxu1 %vm186_vm2, %v587_v49 }
 0xb10   :  { %1459 = vmatpush3.bf16.msra.mxu1 %v1631_v12  ;;  %1369 = vmatprep.mubr.msk.f32.mxu1 %vm1555_vm0, %v1556_v4 }
 0xb11   :  { %1460 = vmatprep.subr.bf16.mxu1 %v1554_v3 }
 0xb14   :  { %1462 = vmatpush3.bf16.msra.mxu1 %v1644_v17 }
 0xb15   :  { %1469 = vmatprep.subr.bf16.mxu1 %v1554_v3 }
 0xbe2   :  { %v656_v51 = vpop.f32.mrb[6].mxu1 }
 0xbe3   :  { %v660_v52 = vadd.f32 %v656_v51, %v164_v50  ;;  %v1349_v53 = vpop.f32.mrb[7].mxu1 }
 0xbe5   :  { %1518 = vtanh.f32 %v660_v52  ;;  %v1190_v55 = vmul.f32 -1.442695, %v660_v52 }
 0xbe7   :  { %1520 = vpow2.f32 %v1190_v55 }
 0xbef   :  { %v1519_v54 = vpop.eup %1518 }
 0xbf0   :  { %670 = vrot.lane.b32.xlu0 %v1519_v54, %s1557_s11 }
 0xbf1   :  { %v1521_v56 = vpop.eup %1520 }
 0xbf2   :  { %v664_v57 = vadd.f32 1.0, %v1521_v56  ;;  %v987_v56 = vld [vmem:[%s1836_s4 + $0x8] sm:$0xff] }
 0xbf4   :  { %1522 = vrcp.f32 %v664_v57  ;;  %v988_v57 = vld [vmem:[%s1836_s4 + $0x10] sm:$0xff] }
 0xbfe   :  { %v1523_v58 = vpop.eup %1522 }
 0xbff   :  { %v668_v61 = vmul.f32 %v1523_v58, %v578_v45 }
 0xc62   :  { %v671_v59 = vpop.permute.xlu0 %670 }
 0xc63   :  { %v673_v60 = vmul.f32 %v1523_v58, %v671_v59  ;;  %v989_v59 = vld [vmem:[%s1836_s4 + $0x18] sm:$0xff] }
 0xc65   :  { %675 = vrot.lane.b32.xlu1 %v673_v60, %s1558_s3  ;;  %v1473_v60 = vpack.c.bf16 %v989_v59, %v988_v57 }
 0xcd7   :  { %v676_v62 = vpop.permute.xlu1 %675 }
 0xcd8   :  { %v678_v63 = vadd.f32 %v676_v62, %v668_v61  ;;  %v1073_v62 = vld [vmem:[%s1837_s6] sm:$0xff] }
 0xcda   :  { %1524 = vtanh.f32 %v678_v63 }
 0xce4   :  { %v1525_v0 = vpop.eup %1524 }
 0xce5   :  { %681 = vrot.lane.b32.xlu0 %v1525_v0, %s1557_s11 }
 0xd57   :  { %v682_v1 = vpop.permute.xlu0 %681 }
 0xd58   :  { %v684_v2 = vmul.f32 %v1523_v58, %v682_v1  ;;  %v1470_v58 = vpack.c.bf16 %v987_v56, %v986_v29 }
 0xd5a   :  { %686 = vrot.lane.b32.xlu1 %v684_v2, %s1558_s3 }
 0xdcc   :  { %v687_v5 = vpop.permute.xlu1 %686 }
 0xdcd   :  { %1359 = vmatmul.mubr.msk.f32.vlgmr.msra.gmra.mrb[10].mxu0 %vm186_vm2, %v687_v5 }
 0xdce   :  { %1465 = vmatpush3.bf16.msra.mxu0 %v1631_v12  ;;  %1380 = vmatprep.mubr.msk.f32.mxu0 %vm1555_vm0, %v1556_v4 }
 0xdcf   :  { %1466 = vmatprep.subr.bf16.mxu0 %v1554_v3 }
 0xdd2   :  { %1468 = vmatpush3.bf16.msra.mxu0 %v1644_v17 }
 0xdd3   :  { %1475 = vmatprep.subr.bf16.mxu0 %v1554_v3 }
 0xea0   :  { %v756_v7 = vpop.f32.mrb[10].mxu0 }
 0xea1   :  { %v760_v8 = vadd.f32 %v756_v7, %v169_v6  ;;  %v1360_v9 = vpop.f32.mrb[11].mxu0  ;;  %v1075_v7 = vld [vmem:[%s1837_s6 + $0x10] sm:$0xff] }
 0xea3   :  { %1526 = vtanh.f32 %v760_v8  ;;  %v1192_v12 = vmul.f32 -1.442695, %v760_v8  ;;  %v1076_v8 = vld [vmem:[%s1837_s6 + $0x18] sm:$0xff] }
 0xea4   :  { %v1479_v9 = vpack.c.bf16 %v1076_v8, %v1075_v7 }
 0xea5   :  { %1528 = vpow2.f32 %v1192_v12 }
 0xead   :  { %v1527_v10 = vpop.eup %1526 }
 0xeae   :  { %770 = vrot.lane.b32.xlu0 %v1527_v10, %s1557_s11 }
 0xeaf   :  { %v1529_v11 = vpop.eup %1528 }
 0xeb0   :  { %v764_v13 = vadd.f32 1.0, %v1529_v11 }
 0xeb2   :  { %1530 = vrcp.f32 %v764_v13 }
 0xebc   :  { %v1531_v14 = vpop.eup %1530 }
 0xebd   :  { %v768_v16 = vmul.f32 %v1531_v14, %v678_v63  ;;  %v1074_v63 = vld [vmem:[%s1837_s6 + $0x8] sm:$0xff] }
 0xebe   :  { %v1476_v0 = vpack.c.bf16 %v1074_v63, %v1073_v62 }
 0xf20   :  { %v771_v15 = vpop.permute.xlu0 %770 }
 0xf21   :  { %v773_v17 = vmul.f32 %v1531_v14, %v771_v15 }
 0xf23   :  { %775 = vrot.lane.b32.xlu1 %v773_v17, %s1558_s3 }
 0xf95   :  { %v776_v18 = vpop.permute.xlu1 %775 }
 0xf96   :  { %v778_v19 = vadd.f32 %v776_v18, %v768_v16 }
 0xf98   :  { %1532 = vtanh.f32 %v778_v19 }
 0xfa2   :  { %v1533_v20 = vpop.eup %1532 }
 0xfa3   :  { %781 = vrot.lane.b32.xlu0 %v1533_v20, %s1557_s11 }
0x1015   :  { %v782_v21 = vpop.permute.xlu0 %781 }
0x1016   :  { %v784_v22 = vmul.f32 %v1531_v14, %v782_v21  ;;  %v1199_v14 = vld [vmem:[%s1839_s7] ss:$0 sm:$0xff] }
0x1018   :  { %786 = vrot.lane.b32.xlu1 %v784_v22, %s1558_s3 }
0x108a   :  { %v787_v23 = vpop.permute.xlu1 %786 }
0x108b   :  { %1370 = vmatmul.mubr.msk.f32.vlgmr.msra.gmra.mrb[8].mxu1 %vm186_vm2, %v787_v23 }
0x108c   :  { %1391 = vmatprep.mubr.msk.f32.mxu1 %vm1555_vm0, %v1556_v4  ;;  %1471 = vmatpush3.bf16.msra.mxu1 %v1470_v58 }
0x108d   :  { %1472 = vmatprep.subr.bf16.mxu1 %v1554_v3 }
0x1090   :  { %1474 = vmatpush3.bf16.msra.mxu1 %v1473_v60 }
0x115e   :  { %v856_v26 = vpop.f32.mrb[8].mxu1 }
0x115f   :  { %v860_v27 = vadd.f32 %v856_v26, %v174_v25  ;;  %v1371_v28 = vpop.f32.mrb[9].mxu1 }
0x1161   :  { %1534 = vtanh.f32 %v860_v27  ;;  %v1194_v32 = vmul.f32 -1.442695, %v860_v27 }
0x1163   :  { %1536 = vpow2.f32 %v1194_v32 }
0x116b   :  { %v1535_v31 = vpop.eup %1534 }
0x116c   :  { %870 = vrot.lane.b32.xlu0 %v1535_v31, %s1557_s11 }
0x116d   :  { %v1537_v33 = vpop.eup %1536 }
0x116e   :  { %v864_v34 = vadd.f32 1.0, %v1537_v33 }
0x1170   :  { %1538 = vrcp.f32 %v864_v34 }
0x117a   :  { %v1539_v35 = vpop.eup %1538 }
0x117b   :  { %v868_v38 = vmul.f32 %v1539_v35, %v778_v19 }
0x11de   :  { %v871_v36 = vpop.permute.xlu0 %870 }
0x11df   :  { %v873_v37 = vmul.f32 %v1539_v35, %v871_v36 }
0x11e1   :  { %875 = vrot.lane.b32.xlu1 %v873_v37, %s1558_s3 }
0x1253   :  { %v876_v39 = vpop.permute.xlu1 %875 }
0x1254   :  { %v878_v30 = vadd.f32 %v876_v39, %v868_v38 }
0x1256   :  { %1540 = vtanh.f32 %v878_v30 }
0x1260   :  { %v1541_v40 = vpop.eup %1540 }
0x1261   :  { %881 = vrot.lane.b32.xlu0 %v1541_v40, %s1557_s11 }
0x12d3   :  { %v882_v41 = vpop.permute.xlu0 %881 }
0x12d4   :  { %v884_v42 = vmul.f32 %v1539_v35, %v882_v41 }
0x12d6   :  { %886 = vrot.lane.b32.xlu1 %v884_v42, %s1558_s3 }
0x1348   :  { %v887_v43 = vpop.permute.xlu1 %886 }
0x1349   :  { %1381 = vmatmul.mubr.msk.f32.vlgmr.msra.gmra.mrb[12].mxu0 %vm186_vm2, %v887_v43 }
0x134a   :  { %1402 = vmatprep.mubr.msk.f32.mxu0 %vm1555_vm0, %v1556_v4  ;;  %1477 = vmatpush3.bf16.msra.mxu0 %v1476_v0 }
0x134b   :  { %1478 = vmatprep.subr.bf16.mxu0 %v1554_v3  ;;  %v1197_v3 = vld [vmem:[%s1838_s5] ss:$0 sm:$0xff] }
0x134e   :  { %1480 = vmatpush3.bf16.msra.mxu0 %v1479_v9 }
0x141c   :  { %v956_v45 = vpop.f32.mrb[12].mxu0 }
0x141d   :  { %v960_v46 = vadd.f32 %v956_v45, %v179_v44  ;;  %v1382_v47 = vpop.f32.mrb[13].mxu0 }
0x141f   :  { %1542 = vtanh.f32 %v960_v46  ;;  %v1196_v49 = vmul.f32 -1.442695, %v960_v46 }
0x1421   :  { %1544 = vpow2.f32 %v1196_v49 }
0x1429   :  { %v1543_v48 = vpop.eup %1542 }
0x142a   :  { %970 = vrot.lane.b32.xlu0 %v1543_v48, %s1557_s11 }
0x142b   :  { %v1545_v50 = vpop.eup %1544 }
0x142c   :  { %v964_v51 = vadd.f32 1.0, %v1545_v50 }
0x142e   :  { %1546 = vrcp.f32 %v964_v51 }
0x1438   :  { %v1547_v52 = vpop.eup %1546 }
0x1439   :  { %v968_v4 = vmul.f32 %v1547_v52, %v878_v30 }
0x149c   :  { %v971_v53 = vpop.permute.xlu0 %970 }
0x149d   :  { %v973_v54 = vmul.f32 %v1547_v52, %v971_v53 }
0x149f   :  { %975 = vrot.lane.b32.xlu1 %v973_v54, %s1558_s3 }
0x1511   :  { %v976_v55 = vpop.permute.xlu1 %975 }
0x1512   :  { %v978_v24 = vadd.f32 %v976_v55, %v968_v4 }
0x1514   :  { %1548 = vtanh.f32 %v978_v24 }
0x151e   :  { %v1549_v61 = vpop.eup %1548 }
0x151f   :  { %981 = vrot.lane.b32.xlu0 %v1549_v61, %s1557_s11 }
0x1591   :  { %v982_v1 = vpop.permute.xlu0 %981 }
0x1592   :  { %v984_v2 = vmul.f32 %v1547_v52, %v982_v1 }
0x1594   :  { %v985_v5 = vmax.f32 %v984_v2, 0.0 }
0x1596   :  { %998 = vrot.lane.b32.xlu1 %v985_v5, %s1558_s3 }
0x1608   :  { %v999_v6 = vpop.permute.xlu1 %998 }
0x1609   :  { %1392 = vmatmul.mubr.msk.f32.vlgmr.msra.gmra.mrb[10].mxu1 %vm186_vm2, %v999_v6 }
0x16dc   :  { %v1068_v10 = vpop.f32.mrb[10].mxu1 }
0x16dd   :  { %v1069_v12 = vadd.f32 %v1197_v3, %v1068_v10  ;;  %v1393_v11 = vpop.f32.mrb[11].mxu1 }
0x16df   :  { %v1072_v13 = vmax.f32 %v1069_v12, 0.0 }
0x16e1   :  { %1403 = vmatmul.mubr.msk.f32.vlgmr.msra.gmra.mrb[14].mxu0 %vm186_vm2, %v1072_v13 }
0x17b4   :  { %v1153_v15 = vpop.f32.mrb[14].mxu0 }
0x17b5   :  { %v1154_v17 = vadd.f32 %v1199_v14, %v1153_v15  ;;  %v1404_v16 = vpop.f32.mrb[15].mxu0 }
0x17b7   :  { %v1157_v18 = vsel %vm52_vm1, %v1154_v17, -inf }
0x17b8   :  { %1158 = vmax.xlane.f32.xlu0 %v1157_v18 }
0x1845   :  { %v1159_v19 = vpop.xlane.xlu0 %1158 }
0x1846   :  { %v1160_v20 = vsub.f32 %v1154_v17, %v1159_v19 }
0x1848   :  { %v1161_v21 = vmul.f32 1.442695, %v1160_v20 }
0x184a   :  { %1550 = vpow2.f32 %v1161_v21 }
0x1854   :  { %v1551_v22 = vpop.eup %1550 }
0x1855   :  { %v1163_v23 = vsel %vm52_vm1, %v1551_v22, 0.0 }
0x1856   :  { %1164 = vadd.xlane.f32.xlu1 %v1163_v23 }
0x18e3   :  { %v1165_v25 = vpop.xlane.xlu1 %1164 }
0x18e4   :  { %1552 = vrcp.f32 %v1165_v25 }
0x18ee   :  { %v1553_v26 = vpop.eup %1552 }
0x18ef   :  { %v1167_v27 = vmul.f32 %v1553_v26, %v1551_v22 }
0x18f1   :  { %1168 = vst.msk [vmem:[%s1840_s8] sm:$0xff] %vm52_vm1, %v1167_v27 }

</bundles_post_ra>
